<compile_context>
chip_gen: v5e
topology: v5e:2x2
jax: 0.10.0
libtpu: 0.0.40
codegen_flags: <defaults>
</compile_context>

<pallas_src>
import math
import numpy as np
import jax
import jax.numpy as jnp
from jax import lax
from jax.experimental import pallas as pl
from jax.experimental.pallas import tpu as pltpu


def _leaky(t):
    # F.leaky_relu(t, 0.3)
    return jnp.where(t > 0, t, 0.3 * t)


_COMPILER_PARAMS = pltpu.CompilerParams(
    dimension_semantics=("parallel",),      # batch grid axis
    vmem_limit_bytes=32 * 1024 * 1024,      # explicit budget (safe for v7x's 64 MiB)
)


# ----------------------------- kernel bodies ------------------------------
# All bodies work on (channels, time) tiles: channels on sublanes, time on lanes.

def _down_body(dec, wd_flat, bias):
    """Valid Conv1d + leaky_relu(0.3) on a (Cin, Ldec) tile.

    dec: (Cin, Ldec); wd_flat: (Cd, Kd*Cin) tap-major; bias: (Cd, 1) f32.
    Returns (Cd, Tdown) float32 with Tdown = Ldec - Kd + 1.
    """
    c_in, l_dec = dec.shape
    kd = wd_flat.shape[1] // c_in
    t_down = l_dec - kd + 1
    # im2col along time -> one MXU matmul with contraction depth Kd*Cin.
    m = jnp.concatenate([dec[:, k:k + t_down] for k in range(kd)], axis=0)
    y = jnp.dot(wd_flat, m, preferred_element_type=jnp.float32)
    return _leaky(y + bias)


def _up_resample_body(y, crop_e, crop_o, coef_e, coef_o, wu_flat, bias, t_half):
    """Polyphase up path: 2*T-1 linear upsample folded into the up conv.

    y: (Cd, T) f32; crop_e/crop_o: (Cin, T) even/odd samples of the centered
    crop of the skip (odd phase zero-padded by one column); coef_e/coef_o:
    (3, T) f32 interpolation coefficients on (y[m-1], y[m], y[m+1]);
    wu_flat: (Cout, Ku*(Cin+Cd)); bias: (Cout, 1) f32.
    Returns (out_even, out_odd), each (Cout, t_half), PRE-activation.
    """
    cd, t = y.shape
    c_in = crop_e.shape[0]
    ku = wu_flat.shape[1] // (c_in + cd)
    # 3-tap interpolation: +-1 lane-shifted copies of y (zero pad; the
    # coefficients are exactly zero wherever the shift would wrap).
    zero = jnp.zeros((cd, 1), y.dtype)
    y_prev = jnp.concatenate([zero, y[:, :t - 1]], axis=1)   # y_prev[:, m] = y[:, m-1]
    y_next = jnp.concatenate([y[:, 1:], zero], axis=1)       # y_next[:, m] = y[:, m+1]
    up_e = coef_e[0:1] * y_prev + coef_e[1:2] * y + coef_e[2:3] * y_next
    up_o = coef_o[0:1] * y_prev + coef_o[1:2] * y + coef_o[2:3] * y_next
    # enriched = concat([crop, up], channel), split by time parity.
    e0 = jnp.concatenate([crop_e, up_e.astype(crop_e.dtype)], axis=0)  # (Cin+Cd, T)
    e1 = jnp.concatenate([crop_o, up_o.astype(crop_o.dtype)], axis=0)
    outs = []
    for p in range(2):                       # output phase: even / odd time steps
        cols = []
        for k in range(ku):                  # tap k reads interleaved index t + k
            src = e0 if ((p + k) & 1) == 0 else e1
            off = (p + k) >> 1
            cols.append(src[:, off:off + t_half])
        m = jnp.concatenate(cols, axis=0)    # (Ku*(Cin+Cd), t_half) im2col
        outs.append(jnp.dot(wu_flat, m, preferred_element_type=jnp.float32) + bias)
    return outs[0], outs[1]


def _up_plain_body(y, crop, wu_flat, bias, t_out):
    """Up path without resampling: skip concat + one im2col conv (pre-activation)."""
    c_in = crop.shape[0]
    cd = y.shape[0]
    ku = wu_flat.shape[1] // (c_in + cd)
    e = jnp.concatenate([crop, y.astype(crop.dtype)], axis=0)
    m = jnp.concatenate([e[:, k:k + t_out] for k in range(ku)], axis=0)
    return jnp.dot(wu_flat, m, preferred_element_type=jnp.float32) + bias


# -------------------------------- kernels ---------------------------------

def _fused_resample_kernel(dec_ref, ce_ref, co_ref, ie_ref, io_ref,
                           wd_ref, bd_ref, wu_ref, bu_ref, o_ref):
    # down conv -> (identity inner) -> polyphase upsample + skip concat + up conv
    y = _down_body(dec_ref[0], wd_ref[...], bd_ref[...])
    out_e, out_o = _up_resample_body(y, ce_ref[0], co_ref[0],
                                     ie_ref[...], io_ref[...],
                                     wu_ref[...], bu_ref[...], o_ref.shape[-1])
    o_ref[0] = jnp.concatenate([out_e, out_o], axis=0)


def _fused_plain_kernel(x_ref, wd_ref, bd_ref, wu_ref, bu_ref, o_ref):
    # resample=False: down conv -> (identity inner) -> skip concat -> up conv
    x = x_ref[0]
    y = _down_body(x, wd_ref[...], bd_ref[...])
    t_in = y.shape[1]
    cs = (x.shape[1] - t_in) // 2                 # centered_crop start
    crop = x[:, cs:cs + t_in]
    o_ref[0] = _up_plain_body(y, crop, wu_ref[...], bu_ref[...], o_ref.shape[-1])


def _down_kernel(dec_ref, wd_ref, bd_ref, o_ref):
    o_ref[0] = _down_body(dec_ref[0], wd_ref[...], bd_ref[...])


def _up_resample_kernel(y_ref, ce_ref, co_ref, ie_ref, io_ref,
                        wu_ref, bu_ref, o_ref):
    out_e, out_o = _up_resample_body(y_ref[0], ce_ref[0], co_ref[0],
                                     ie_ref[...], io_ref[...],
                                     wu_ref[...], bu_ref[...], o_ref.shape[-1])
    o_ref[0] = jnp.concatenate([out_e, out_o], axis=0)


def _up_plain_kernel(y_ref, crop_ref, wu_ref, bu_ref, o_ref):
    o_ref[0] = _up_plain_body(y_ref[0], crop_ref[0],
                              wu_ref[...], bu_ref[...], o_ref.shape[-1])


# ------------------------------ glue helpers ------------------------------

def _interp_phase_coeffs(t_in, t_out):
    """torch F.interpolate(mode='linear', align_corners=False) from t_in -> t_out,
    decomposed per output j as  up[j] = sum_{s in {-1,0,+1}} coef[s+1, j] * y[j//2 + s].
    Returns (coef (3, t_out) f32, i0, i1, lam); the raw gather form is reused by
    the pure-JAX reference so kernel and reference share identical interp math."""
    scale = t_in / t_out
    j = np.arange(t_out)
    src = np.maximum(scale * (j + 0.5) - 0.5, 0.0)
    i0 = np.minimum(np.floor(src).astype(np.int64), t_in - 1)
    i1 = np.minimum(i0 + 1, t_in - 1)
    lam = (src - i0).astype(np.float32)
    h = j // 2
    coef = np.zeros((3, t_out), np.float32)
    for idx, w in ((i0, (1.0 - lam).astype(np.float32)), (i1, lam)):
        s = idx - h
        assert np.all((s >= -1) & (s <= 1)), "interp support exceeds 3-tap window"
        coef[s + 1, j] += w
    return coef, i0, i1, lam


class ResampleBlockPallas:
    """Pallas TPU implementation of ResampleBlock's forward pass.

    Parameters are initialized like the PyTorch module (xavier-uniform weights,
    zero biases).  inner_module=None means identity and enables the fully fused
    single-kernel path; a callable inner module runs as plain JAX on NCW
    (B, Cd, T) tensors between the down and up kernels."""

    def __init__(self, input_channels, down_channels, down_kernel_size,
                 up_kernel_size, inner_module=None, resample=True,
                 output_channels=None, output_activation=None, key=None,
                 compute_dtype=jnp.float32):
        self.resample = resample
        self.cin = input_channels
        self.cd = down_channels
        self.kd = down_kernel_size
        self.ku = up_kernel_size
        self.cout = output_channels if output_channels else input_channels
        self.inner_module = inner_module
        self.output_activation = output_activation if output_activation else _leaky
        self.compute_dtype = compute_dtype   # set jnp.bfloat16 on v6e/v7x for ~2x HBM BW
        if key is None:
            key = jax.random.PRNGKey(0)
        k_d, k_u = jax.random.split(key)
        # torch.nn.init.xavier_uniform_ on Conv1d weight (Cout, Cin, K):
        bd = math.sqrt(6.0 / (self.cin * self.kd + self.cd * self.kd))
        self.w_down = jax.random.uniform(k_d, (self.cd, self.cin, self.kd),
                                         jnp.float32, -bd, bd)
        self.b_down = jnp.zeros((self.cd,), jnp.float32)
        bu = math.sqrt(6.0 / ((self.cd + self.cin) * self.ku + self.cout * self.ku))
        self.w_up = jax.random.uniform(k_u, (self.cout, self.cin + self.cd, self.ku),
                                       jnp.float32, -bu, bu)
        self.b_up = jnp.zeros((self.cout,), jnp.float32)
        # Kernel-side layouts: im2col weights (tap-major flattened contraction),
        # biases as (C, 1) columns broadcast over the time/lane axis (kept f32).
        self.wd_flat = jnp.transpose(self.w_down, (0, 2, 1)).reshape(
            self.cd, self.kd * self.cin).astype(compute_dtype)
        self.wu_flat = jnp.transpose(self.w_up, (0, 2, 1)).reshape(
            self.cout, self.ku * (self.cin + self.cd)).astype(compute_dtype)
        self.bd2 = self.b_down[:, None]
        self.bu2 = self.b_up[:, None]

    # ----------------------- wrapper-side preprocessing -----------------------

    @staticmethod
    def _batch_spec(shape):
        # one batch element per grid step; full channel/time extents per block
        return pl.BlockSpec((1,) + tuple(shape[1:]),
                            lambda b: (b,) + (0,) * (len(shape) - 1))

    @staticmethod
    def _shared_spec(shape):
        return pl.BlockSpec(tuple(shape), lambda b: (0,) * len(shape))

    def _up_resample_inputs(self, xd, t_in):
        """Skip-crop phase slices + interpolation coefficients for an up block
        whose (inner) input has length t_in."""
        L = xd.shape[2]
        t_up = 2 * t_in - 1
        t_out = t_up - self.ku + 1
        assert t_out >= 1, "up_kernel_size too large for the upsampled length"
        d = L - t_up
        assert d >= 0, "skip connection is shorter than the upsampled signal"
        cs = d // 2                                       # centered_crop start
        crop_e = xd[:, :, cs:cs + t_up:2]                 # (B, Cin, t_in)   even phase
        crop_o = jnp.pad(xd[:, :, cs + 1:cs + t_up:2],
                         ((0, 0), (0, 0), (0, 1)))        # (B, Cin, t_in)   odd phase
        coef, _, _, _ = _interp_phase_coeffs(t_in, t_up)
        coef_e = jnp.asarray(coef[:, 0::2])                             # (3, t_in)
        coef_o = jnp.asarray(np.pad(coef[:, 1::2], ((0, 0), (0, 1))))   # (3, t_in)
        t_pad = (t_out + 1) // 2                          # per-phase output width
        return crop_e, crop_o, coef_e, coef_o, t_out, t_pad

    def _interleave_phases(self, out_ph, t_out):
        """(B, 2*Cout, t_pad) phase slabs -> (B, Cout, t_out) interleaved output."""
        b, _, t_pad = out_ph.shape
        oe = out_ph[:, :self.cout, :]
        oo = out_ph[:, self.cout:, :]
        out = jnp.stack([oe, oo], axis=-1).reshape(b, self.cout, 2 * t_pad)
        return out[:, :, :t_out]

    # -------------------------------- forward --------------------------------

    def __call__(self, x):
        """x: (B, Cin, L) NCW float input.  Returns (B, Cout, Tout) float32."""
        B, cin, L = x.shape
        assert cin == self.cin
        xd = x.astype(self.compute_dtype)
        dec = xd[:, :, ::2] if self.resample else xd      # zero-FLOP strided decimation
        l_dec = dec.shape[2]
        t_down = l_dec - self.kd + 1
        assert t_down >= 1, "down_kernel_size too large for the (decimated) input"

        if self.inner_module is None:
            out = self._fused_forward(xd, dec, B, L, t_down)
        else:
            out = self._split_forward(xd, dec, B, L, t_down)
        # output activation applied here (fuses with the XLA interleave/reshape);
        # supports a custom, possibly non-elementwise, output_activation.
        return self.output_activation(out)

    def _fused_forward(self, xd, dec, B, L, t_down):
        if self.resample:
            crop_e, crop_o, coef_e, coef_o, t_out, t_pad = \
                self._up_resample_inputs(xd, t_down)
            out_ph = pl.pallas_call(
                _fused_resample_kernel,
                out_shape=jax.ShapeDtypeStruct((B, 2 * self.cout, t_pad), jnp.float32),
                grid=(B,),
                in_specs=[
                    self._batch_spec(dec.shape),
                    self._batch_spec(crop_e.shape),
                    self._batch_spec(crop_o.shape),
                    self._shared_spec(coef_e.shape),
                    self._shared_spec(coef_o.shape),
                    self._shared_spec(self.wd_flat.shape),
                    self._shared_spec(self.bd2.shape),
                    self._shared_spec(self.wu_flat.shape),
                    self._shared_spec(self.bu2.shape),
                ],
                out_specs=self._batch_spec((B, 2 * self.cout, t_pad)),
                compiler_params=_COMPILER_PARAMS,
            )(dec, crop_e, crop_o, coef_e, coef_o,
              self.wd_flat, self.bd2, self.wu_flat, self.bu2)
            return self._interleave_phases(out_ph, t_out)

        t_out = t_down - self.ku + 1
        assert t_out >= 1, "up_kernel_size too large for the down block output"
        return pl.pallas_call(
            _fused_plain_kernel,
            out_shape=jax.ShapeDtypeStruct((B, self.cout, t_out), jnp.float32),
            grid=(B,),
            in_specs=[
                self._batch_spec(xd.shape),
                self._shared_spec(self.wd_flat.shape),
                self._shared_spec(self.bd2.shape),
                self._shared_spec(self.wu_flat.shape),
                self._shared_spec(self.bu2.shape),
            ],
            out_specs=self._batch_spec((B, self.cout, t_out)),
            compiler_params=_COMPILER_PARAMS,
        )(xd, self.wd_flat, self.bd2, self.wu_flat, self.bu2)

    def _split_forward(self, xd, dec, B, L, t_down):
        # down block as its own kernel; the inner module runs as plain JAX on NCW.
        down = pl.pallas_call(
            _down_kernel,
            out_shape=jax.ShapeDtypeStruct((B, self.cd, t_down), jnp.float32),
            grid=(B,),
            in_specs=[
                self._batch_spec(dec.shape),
                self._shared_spec(self.wd_flat.shape),
                self._shared_spec(self.bd2.shape),
            ],
            out_specs=self._batch_spec((B, self.cd, t_down)),
            compiler_params=_COMPILER_PARAMS,
        )(dec, self.wd_flat, self.bd2)

        y = self.inner_module(down)                        # (B, Cd, t_in)
        assert y.shape[0] == B and y.shape[1] == self.cd
        t_in = y.shape[2]

        if self.resample:
            crop_e, crop_o, coef_e, coef_o, t_out, t_pad = \
                self._up_resample_inputs(xd, t_in)
            out_ph = pl.pallas_call(
                _up_resample_kernel,
                out_shape=jax.ShapeDtypeStruct((B, 2 * self.cout, t_pad), jnp.float32),
                grid=(B,),
                in_specs=[
                    self._batch_spec(y.shape),
                    self._batch_spec(crop_e.shape),
                    self._batch_spec(crop_o.shape),
                    self._shared_spec(coef_e.shape),
                    self._shared_spec(coef_o.shape),
                    self._shared_spec(self.wu_flat.shape),
                    self._shared_spec(self.bu2.shape),
                ],
                out_specs=self._batch_spec((B, 2 * self.cout, t_pad)),
                compiler_params=_COMPILER_PARAMS,
            )(y, crop_e, crop_o, coef_e, coef_o, self.wu_flat, self.bu2)
            return self._interleave_phases(out_ph, t_out)

        t_out = t_in - self.ku + 1
        assert t_out >= 1, "up_kernel_size too large for the inner module output"
        d = L - t_in
        assert d >= 0, "skip connection is shorter than the inner module output"
        crop = xd[:, :, d // 2:d // 2 + t_in]
        return pl.pallas_call(
            _up_plain_kernel,
            out_shape=jax.ShapeDtypeStruct((B, self.cout, t_out), jnp.float32),
            grid=(B,),
            in_specs=[
                self._batch_spec(y.shape),
                self._batch_spec(crop.shape),
                self._shared_spec(self.wu_flat.shape),
                self._shared_spec(self.bu2.shape),
            ],
            out_specs=self._batch_spec((B, self.cout, t_out)),
            compiler_params=_COMPILER_PARAMS,
        )(y, crop, self.wu_flat, self.bu2)


# --------------------------- pure-JAX reference ----------------------------

def _ref_forward(x, w_down, b_down, w_up, b_up, resample=True, inner=None,
                 output_activation=None):
    act = output_activation if output_activation else _leaky
    dn = ('NCH', 'OIH', 'NCH')
    hi = lax.Precision.HIGHEST
    dec = x[:, :, ::2] if resample else x
    down = lax.conv_general_dilated(dec, w_down, (1,), 'VALID',
                                    dimension_numbers=dn, precision=hi)
    down = _leaky(down + b_down[None, :, None])
    y = inner(down) if inner is not None else down
    if resample:
        t_in = y.shape[2]
        t_up = 2 * t_in - 1
        _, i0, i1, lam = _interp_phase_coeffs(t_in, t_up)
        lam = jnp.asarray(lam)
        up = (1.0 - lam)[None, None, :] * y[:, :, i0] + lam[None, None, :] * y[:, :, i1]
    else:
        up = y
    d = x.shape[2] - up.shape[2]
    crop = x[:, :, d // 2:d // 2 + up.shape[2]]
    enr = jnp.concatenate([crop, up], axis=1)
    out = lax.conv_general_dilated(enr, w_up, (1,), 'VALID',
                                   dimension_numbers=dn, precision=hi)
    return act(out + b_up[None, :, None])


if __name__ == "__main__":
    key = jax.random.PRNGKey(0)
    kp1, kp2, kx = jax.random.split(key, 3)

    B, Cin, Cd, Kd, Ku, L = 2, 4, 8, 5, 5, 64
    x = jax.random.normal(kx, (B, Cin, L), jnp.float32)       # PyTorch NCW input

    # 1) fused single-kernel path: identity inner module, resample=True.
    blk = ResampleBlockPallas(Cin, Cd, Kd, Ku, inner_module=None,
                              resample=True, key=kp1)
    out = jax.block_until_ready(blk(x))                        # (2, 4, 51)
    ref = _ref_forward(x, blk.w_down, blk.b_down, blk.w_up, blk.b_up, resample=True)
    assert out.shape == ref.shape, (out.shape, ref.shape)
    np.testing.assert_allclose(np.asarray(out), np.asarray(ref), rtol=1e-2, atol=1e-2)

    # 2) split path: non-identity inner module (tanh), resample=True.
    inner = lambda t: jnp.tanh(t)
    blk2 = ResampleBlockPallas(Cin, Cd, Kd, Ku, inner_module=inner,
                               resample=True, key=kp1)
    out2 = jax.block_until_ready(blk2(x))
    ref2 = _ref_forward(x, blk2.w_down, blk2.b_down, blk2.w_up, blk2.b_up,
                        resample=True, inner=inner)
    assert out2.shape == ref2.shape, (out2.shape, ref2.shape)
    np.testing.assert_allclose(np.asarray(out2), np.asarray(ref2), rtol=1e-2, atol=1e-2)

    # 3) fused path without resampling (top-level conv pair), different Cout.
    blk3 = ResampleBlockPallas(Cin, Cd, Kd, Ku, inner_module=None,
                               resample=False, output_channels=6, key=kp2)
    out3 = jax.block_until_ready(blk3(x))                      # (2, 6, 56)
    ref3 = _ref_forward(x, blk3.w_down, blk3.b_down, blk3.w_up, blk3.b_up,
                        resample=False)
    assert out3.shape == ref3.shape, (out3.shape, ref3.shape)
    np.testing.assert_allclose(np.asarray(out3), np.asarray(ref3), rtol=1e-2, atol=1e-2)

    print("KERNEL_OK")
</pallas_src>

<mosaic_0001>
module attributes {stable_mosaic.version = 11 : i64} {
  func.func @_fused_resample_kernel(%arg0: i32, %arg1: memref<1x4x32xf32, #tpu.memory_space<vmem>>, %arg2: memref<1x4x28xf32, #tpu.memory_space<vmem>>, %arg3: memref<1x4x28xf32, #tpu.memory_space<vmem>>, %arg4: memref<3x28xf32, #tpu.memory_space<vmem>>, %arg5: memref<3x28xf32, #tpu.memory_space<vmem>>, %arg6: memref<8x20xf32, #tpu.memory_space<vmem>>, %arg7: memref<8x1xf32, #tpu.memory_space<vmem>>, %arg8: memref<4x60xf32, #tpu.memory_space<vmem>>, %arg9: memref<4x1xf32, #tpu.memory_space<vmem>>, %arg10: memref<1x8x26xf32, #tpu.memory_space<vmem>>) attributes {dimension_semantics = [#tpu.dimension_semantics<parallel>], iteration_bounds = array<i64: 2>, scalar_prefetch = 0 : i64, scratch_operands = 0 : i64, tpu.core_type = #tpu.core_type<tc>, window_params = [{transform_indices = @transform_0, window_bounds = array<i64: 1, 4, 32>}, {transform_indices = @transform_1, window_bounds = array<i64: 1, 4, 28>}, {transform_indices = @transform_2, window_bounds = array<i64: 1, 4, 28>}, {pipeline_mode = #tpu.pipeline_mode<synchronous>, transform_indices = @transform_3, window_bounds = array<i64: 3, 28>}, {pipeline_mode = #tpu.pipeline_mode<synchronous>, transform_indices = @transform_4, window_bounds = array<i64: 3, 28>}, {pipeline_mode = #tpu.pipeline_mode<synchronous>, transform_indices = @transform_5, window_bounds = array<i64: 8, 20>}, {pipeline_mode = #tpu.pipeline_mode<synchronous>, transform_indices = @transform_6, window_bounds = array<i64: 8, 1>}, {pipeline_mode = #tpu.pipeline_mode<synchronous>, transform_indices = @transform_7, window_bounds = array<i64: 4, 60>}, {pipeline_mode = #tpu.pipeline_mode<synchronous>, transform_indices = @transform_8, window_bounds = array<i64: 4, 1>}, {transform_indices = @transform_9, window_bounds = array<i64: 1, 8, 26>}]} {
    %c0 = arith.constant 0 : index
    %c0_0 = arith.constant 0 : index
    %c0_1 = arith.constant 0 : index
    %0 = vector.load %arg1[%c0, %c0_0, %c0_1] : memref<1x4x32xf32, #tpu.memory_space<vmem>>, vector<1x4x32xf32>
    %1 = vector.shape_cast %0 : vector<1x4x32xf32> to vector<4x32xf32>
    %c0_2 = arith.constant 0 : index
    %c0_3 = arith.constant 0 : index
    %2 = vector.load %arg6[%c0_2, %c0_3] : memref<8x20xf32, #tpu.memory_space<vmem>>, vector<8x20xf32>
    %c0_4 = arith.constant 0 : index
    %c0_5 = arith.constant 0 : index
    %3 = vector.load %arg7[%c0_4, %c0_5] : memref<8x1xf32, #tpu.memory_space<vmem>>, vector<8x1xf32>
    %4 = vector.extract_strided_slice %1 {offsets = [0, 0], sizes = [4, 28], strides = [1, 1]} : vector<4x32xf32> to vector<4x28xf32>
    %5 = vector.extract_strided_slice %1 {offsets = [0, 1], sizes = [4, 28], strides = [1, 1]} : vector<4x32xf32> to vector<4x28xf32>
    %6 = vector.extract_strided_slice %1 {offsets = [0, 2], sizes = [4, 28], strides = [1, 1]} : vector<4x32xf32> to vector<4x28xf32>
    %7 = vector.extract_strided_slice %1 {offsets = [0, 3], sizes = [4, 28], strides = [1, 1]} : vector<4x32xf32> to vector<4x28xf32>
    %8 = vector.extract_strided_slice %1 {offsets = [0, 4], sizes = [4, 28], strides = [1, 1]} : vector<4x32xf32> to vector<4x28xf32>
    %9 = tpu.concatenate %4, %5, %6, %7, %8 in 0 : vector<4x28xf32>, vector<4x28xf32>, vector<4x28xf32>, vector<4x28xf32>, vector<4x28xf32> -> vector<20x28xf32>
    %cst = arith.constant dense<0.000000e+00> : vector<8x28xf32>
    %10 = tpu.matmul %2, %9, %cst {dimension_numbers = #tpu.dot_dimension_numbers<[1], [0], [0], [1], [0, 0, 1, 1], [], []>} : vector<8x20xf32>, vector<20x28xf32>, vector<8x28xf32> -> vector<8x28xf32>
    %11 = vector.broadcast %3 : vector<8x1xf32> to vector<8x28xf32>
    %12 = arith.addf %10, %11 : vector<8x28xf32>
    %cst_6 = arith.constant 0.000000e+00 : f32
    %13 = vector.broadcast %cst_6 : f32 to vector<8x28xf32>
    %14 = arith.cmpf ogt, %12, %13 : vector<8x28xf32>
    %cst_7 = arith.constant 3.000000e-01 : f32
    %15 = vector.broadcast %cst_7 : f32 to vector<8x28xf32>
    %16 = arith.mulf %15, %12 : vector<8x28xf32>
    %17 = arith.select %14, %12, %16 : vector<8x28xi1>, vector<8x28xf32>
    %c0_8 = arith.constant 0 : index
    %c0_9 = arith.constant 0 : index
    %c0_10 = arith.constant 0 : index
    %18 = vector.load %arg2[%c0_8, %c0_9, %c0_10] : memref<1x4x28xf32, #tpu.memory_space<vmem>>, vector<1x4x28xf32>
    %19 = vector.shape_cast %18 : vector<1x4x28xf32> to vector<4x28xf32>
    %c0_11 = arith.constant 0 : index
    %c0_12 = arith.constant 0 : index
    %c0_13 = arith.constant 0 : index
    %20 = vector.load %arg3[%c0_11, %c0_12, %c0_13] : memref<1x4x28xf32, #tpu.memory_space<vmem>>, vector<1x4x28xf32>
    %21 = vector.shape_cast %20 : vector<1x4x28xf32> to vector<4x28xf32>
    %c0_14 = arith.constant 0 : index
    %c0_15 = arith.constant 0 : index
    %22 = vector.load %arg4[%c0_14, %c0_15] : memref<3x28xf32, #tpu.memory_space<vmem>>, vector<3x28xf32>
    %c0_16 = arith.constant 0 : index
    %c0_17 = arith.constant 0 : index
    %23 = vector.load %arg5[%c0_16, %c0_17] : memref<3x28xf32, #tpu.memory_space<vmem>>, vector<3x28xf32>
    %c0_18 = arith.constant 0 : index
    %c0_19 = arith.constant 0 : index
    %24 = vector.load %arg8[%c0_18, %c0_19] : memref<4x60xf32, #tpu.memory_space<vmem>>, vector<4x60xf32>
    %c0_20 = arith.constant 0 : index
    %c0_21 = arith.constant 0 : index
    %25 = vector.load %arg9[%c0_20, %c0_21] : memref<4x1xf32, #tpu.memory_space<vmem>>, vector<4x1xf32>
    %cst_22 = arith.constant 0.000000e+00 : f32
    %26 = vector.broadcast %cst_22 : f32 to vector<8x1xf32>
    %27 = vector.extract_strided_slice %17 {offsets = [0, 0], sizes = [8, 27], strides = [1, 1]} : vector<8x28xf32> to vector<8x27xf32>
    %28 = tpu.concatenate %26, %27 in 1 : vector<8x1xf32>, vector<8x27xf32> -> vector<8x28xf32>
    %29 = vector.extract_strided_slice %17 {offsets = [0, 1], sizes = [8, 27], strides = [1, 1]} : vector<8x28xf32> to vector<8x27xf32>
    %30 = tpu.concatenate %29, %26 in 1 : vector<8x27xf32>, vector<8x1xf32> -> vector<8x28xf32>
    %31 = vector.extract_strided_slice %22 {offsets = [0, 0], sizes = [1, 28], strides = [1, 1]} : vector<3x28xf32> to vector<1x28xf32>
    %32 = vector.broadcast %31 : vector<1x28xf32> to vector<8x28xf32>
    %33 = arith.mulf %32, %28 : vector<8x28xf32>
    %34 = vector.extract_strided_slice %22 {offsets = [1, 0], sizes = [1, 28], strides = [1, 1]} : vector<3x28xf32> to vector<1x28xf32>
    %35 = vector.broadcast %34 : vector<1x28xf32> to vector<8x28xf32>
    %36 = arith.mulf %35, %17 : vector<8x28xf32>
    %37 = arith.addf %33, %36 : vector<8x28xf32>
    %38 = vector.extract_strided_slice %22 {offsets = [2, 0], sizes = [1, 28], strides = [1, 1]} : vector<3x28xf32> to vector<1x28xf32>
    %39 = vector.broadcast %38 : vector<1x28xf32> to vector<8x28xf32>
    %40 = arith.mulf %39, %30 : vector<8x28xf32>
    %41 = arith.addf %37, %40 : vector<8x28xf32>
    %42 = vector.extract_strided_slice %23 {offsets = [0, 0], sizes = [1, 28], strides = [1, 1]} : vector<3x28xf32> to vector<1x28xf32>
    %43 = vector.broadcast %42 : vector<1x28xf32> to vector<8x28xf32>
    %44 = arith.mulf %43, %28 : vector<8x28xf32>
    %45 = vector.extract_strided_slice %23 {offsets = [1, 0], sizes = [1, 28], strides = [1, 1]} : vector<3x28xf32> to vector<1x28xf32>
    %46 = vector.broadcast %45 : vector<1x28xf32> to vector<8x28xf32>
    %47 = arith.mulf %46, %17 : vector<8x28xf32>
    %48 = arith.addf %44, %47 : vector<8x28xf32>
    %49 = vector.extract_strided_slice %23 {offsets = [2, 0], sizes = [1, 28], strides = [1, 1]} : vector<3x28xf32> to vector<1x28xf32>
    %50 = vector.broadcast %49 : vector<1x28xf32> to vector<8x28xf32>
    %51 = arith.mulf %50, %30 : vector<8x28xf32>
    %52 = arith.addf %48, %51 : vector<8x28xf32>
    %53 = tpu.concatenate %19, %41 in 0 : vector<4x28xf32>, vector<8x28xf32> -> vector<12x28xf32>
    %54 = tpu.concatenate %21, %52 in 0 : vector<4x28xf32>, vector<8x28xf32> -> vector<12x28xf32>
    %55 = vector.extract_strided_slice %53 {offsets = [0, 0], sizes = [12, 26], strides = [1, 1]} : vector<12x28xf32> to vector<12x26xf32>
    %56 = vector.extract_strided_slice %54 {offsets = [0, 0], sizes = [12, 26], strides = [1, 1]} : vector<12x28xf32> to vector<12x26xf32>
    %57 = vector.extract_strided_slice %53 {offsets = [0, 1], sizes = [12, 26], strides = [1, 1]} : vector<12x28xf32> to vector<12x26xf32>
    %58 = vector.extract_strided_slice %54 {offsets = [0, 1], sizes = [12, 26], strides = [1, 1]} : vector<12x28xf32> to vector<12x26xf32>
    %59 = vector.extract_strided_slice %53 {offsets = [0, 2], sizes = [12, 26], strides = [1, 1]} : vector<12x28xf32> to vector<12x26xf32>
    %60 = tpu.concatenate %55, %56, %57, %58, %59 in 0 : vector<12x26xf32>, vector<12x26xf32>, vector<12x26xf32>, vector<12x26xf32>, vector<12x26xf32> -> vector<60x26xf32>
    %cst_23 = arith.constant dense<0.000000e+00> : vector<4x26xf32>
    %61 = tpu.matmul %24, %60, %cst_23 {dimension_numbers = #tpu.dot_dimension_numbers<[1], [0], [0], [1], [0, 0, 1, 1], [], []>} : vector<4x60xf32>, vector<60x26xf32>, vector<4x26xf32> -> vector<4x26xf32>
    %62 = vector.broadcast %25 : vector<4x1xf32> to vector<4x26xf32>
    %63 = arith.addf %61, %62 : vector<4x26xf32>
    %64 = vector.extract_strided_slice %54 {offsets = [0, 0], sizes = [12, 26], strides = [1, 1]} : vector<12x28xf32> to vector<12x26xf32>
    %65 = vector.extract_strided_slice %53 {offsets = [0, 1], sizes = [12, 26], strides = [1, 1]} : vector<12x28xf32> to vector<12x26xf32>
    %66 = vector.extract_strided_slice %54 {offsets = [0, 1], sizes = [12, 26], strides = [1, 1]} : vector<12x28xf32> to vector<12x26xf32>
    %67 = vector.extract_strided_slice %53 {offsets = [0, 2], sizes = [12, 26], strides = [1, 1]} : vector<12x28xf32> to vector<12x26xf32>
    %68 = vector.extract_strided_slice %54 {offsets = [0, 2], sizes = [12, 26], strides = [1, 1]} : vector<12x28xf32> to vector<12x26xf32>
    %69 = tpu.concatenate %64, %65, %66, %67, %68 in 0 : vector<12x26xf32>, vector<12x26xf32>, vector<12x26xf32>, vector<12x26xf32>, vector<12x26xf32> -> vector<60x26xf32>
    %cst_24 = arith.constant dense<0.000000e+00> : vector<4x26xf32>
    %70 = tpu.matmul %24, %69, %cst_24 {dimension_numbers = #tpu.dot_dimension_numbers<[1], [0], [0], [1], [0, 0, 1, 1], [], []>} : vector<4x60xf32>, vector<60x26xf32>, vector<4x26xf32> -> vector<4x26xf32>
    %71 = vector.broadcast %25 : vector<4x1xf32> to vector<4x26xf32>
    %72 = arith.addf %70, %71 : vector<4x26xf32>
    %73 = tpu.concatenate %63, %72 in 0 : vector<4x26xf32>, vector<4x26xf32> -> vector<8x26xf32>
    %c0_25 = arith.constant 0 : index
    %c0_26 = arith.constant 0 : index
    %c0_27 = arith.constant 0 : index
    %74 = vector.load %arg10[%c0_25, %c0_26, %c0_27] : memref<1x8x26xf32, #tpu.memory_space<vmem>>, vector<1x8x26xf32>
    %75 = vector.shape_cast %74 : vector<1x8x26xf32> to vector<8x26xf32>
    %76 = vector.shape_cast %73 : vector<8x26xf32> to vector<1x8x26xf32>
    tpu.vector_store %arg10[%c0_25, %c0_26, %c0_27], %76 {strides = array<i32>} : memref<1x8x26xf32, #tpu.memory_space<vmem>>, vector<1x8x26xf32>,
    return
  }
  func.func @transform_0(%arg0: i32) -> (i32, i32, i32) {
    %c0_i32 = arith.constant 0 : i32
    %c0_i32_0 = arith.constant 0 : i32
    %c0_i32_1 = arith.constant 0 : i32
    return %arg0, %c0_i32, %c0_i32_0 : i32, i32, i32
  }
  func.func @transform_1(%arg0: i32) -> (i32, i32, i32) {
    %c0_i32 = arith.constant 0 : i32
    %c0_i32_0 = arith.constant 0 : i32
    %c0_i32_1 = arith.constant 0 : i32
    return %arg0, %c0_i32, %c0_i32_0 : i32, i32, i32
  }
  func.func @transform_2(%arg0: i32) -> (i32, i32, i32) {
    %c0_i32 = arith.constant 0 : i32
    %c0_i32_0 = arith.constant 0 : i32
    %c0_i32_1 = arith.constant 0 : i32
    return %arg0, %c0_i32, %c0_i32_0 : i32, i32, i32
  }
  func.func @transform_3(%arg0: i32) -> (i32, i32) {
    %c0_i32 = arith.constant 0 : i32
    %c0_i32_0 = arith.constant 0 : i32
    %c0_i32_1 = arith.constant 0 : i32
    return %c0_i32, %c0_i32_0 : i32, i32
  }
  func.func @transform_4(%arg0: i32) -> (i32, i32) {
    %c0_i32 = arith.constant 0 : i32
    %c0_i32_0 = arith.constant 0 : i32
    %c0_i32_1 = arith.constant 0 : i32
    return %c0_i32, %c0_i32_0 : i32, i32
  }
  func.func @transform_5(%arg0: i32) -> (i32, i32) {
    %c0_i32 = arith.constant 0 : i32
    %c0_i32_0 = arith.constant 0 : i32
    %c0_i32_1 = arith.constant 0 : i32
    return %c0_i32, %c0_i32_0 : i32, i32
  }
  func.func @transform_6(%arg0: i32) -> (i32, i32) {
    %c0_i32 = arith.constant 0 : i32
    %c0_i32_0 = arith.constant 0 : i32
    %c0_i32_1 = arith.constant 0 : i32
    return %c0_i32, %c0_i32_0 : i32, i32
  }
  func.func @transform_7(%arg0: i32) -> (i32, i32) {
    %c0_i32 = arith.constant 0 : i32
    %c0_i32_0 = arith.constant 0 : i32
    %c0_i32_1 = arith.constant 0 : i32
    return %c0_i32, %c0_i32_0 : i32, i32
  }
  func.func @transform_8(%arg0: i32) -> (i32, i32) {
    %c0_i32 = arith.constant 0 : i32
    %c0_i32_0 = arith.constant 0 : i32
    %c0_i32_1 = arith.constant 0 : i32
    return %c0_i32, %c0_i32_0 : i32, i32
  }
  func.func @transform_9(%arg0: i32) -> (i32, i32, i32) {
    %c0_i32 = arith.constant 0 : i32
    %c0_i32_0 = arith.constant 0 : i32
    %c0_i32_1 = arith.constant 0 : i32
    return %arg0, %c0_i32, %c0_i32_0 : i32, i32, i32
  }
}

</mosaic_0001>

<bundles_post_ra>
// kernel: tpu_custom_call.1
= control target key start
LH: loop header
LB: loop body
LE: loop exit
PB: predicated region body
PF: predicated region fallthrough
CT: control target
= control target key end

     0   :  { %s1394_s0 = inlined_call_operand.vmem [shape: f32[2,4,32], index: 0, kind: input, shape index: {}]   ;;  %s1395_s1 = inlined_call_operand.hbm [shape: f32[2,4,28], index: 1, kind: input, shape index: {}]   ;;  %s1396_s2 = inlined_call_operand.hbm [shape: f32[2,4,28], index: 2, kind: input, shape index: {}]   ;;  %s1397_s3 = inlined_call_operand.vmem [shape: f32[3,28], index: 3, kind: input, shape index: {}]   ;;  %s1398_s4 = inlined_call_operand.hbm [shape: f32[3,28], index: 4, kind: input, shape index: {}]   ;;  %s1399_s5 = inlined_call_operand.hbm [shape: f32[8,20], index: 5, kind: input, shape index: {}]   ;;  %s1400_s6 = inlined_call_operand.vmem [shape: f32[8,1], index: 6, kind: input, shape index: {}]   ;;  %s1401_s7 = inlined_call_operand.vmem [shape: f32[4,60], index: 7, kind: input, shape index: {}]   ;;  %s1402_s8 = inlined_call_operand.vmem [shape: f32[4,1], index: 8, kind: input, shape index: {}]   ;;  %s1403_s9 = inlined_call_operand.hbm [shape: f32[2,8,26], index: 9, kind: output, shape index: {}]  }
   0x1   :  { %1410 = sst [smem:[#allocation22_spill]] %s1398_s4 }
   0x2   :  { %1411 = sst [smem:[#allocation23_spill]] %s1399_s5 }
   0x3   :  { %14 = vsyncpa [#allocation3], 0 }
   0x4   :  { %16 = vsyncpa [#allocation3 + $0x1], 0 }
   0x5   :  { %17 = vsyncpa [#allocation6], 0 }
   0x6   :  { %19 = vsyncpa [#allocation6 + $0x1], 0 }
   0x7   :  { %20 = vsyncpa [#allocation9], 0 }
   0x8   :  { %21 = vsyncpa [#allocation4], 0 }
   0x9   :  { %23 = vsyncpa [#allocation4 + $0x1], 0  ;;  %s1172_s30 = smov 0   ;;  %s1174_s10 = smov 0  }
   0xa   :  { %s1176_s11 = smov 0   ;;  %s1178_s12 = smov 0  }
   0xb LB: > { %1412 = sst [smem:[#allocation16_spill]] %s1100_s30  ;;  %s1193_s13 = sadd.s32 4294967295, %s1112_s12   ;;  %s1112_s12 = sphi %s1178_s12, %s1429_s12   ;;  %s1108_s11 = sphi %s1176_s11, %s1431_s11   ;;  %s1104_s10 = sphi %s1174_s10, %s1433_s10   ;;  %s1100_s30 = sphi %s1172_s30, %s1432_s30  }
   0xc   : > { %1413 = sst [smem:[#allocation17_spill]] %s1108_s11  ;;  %s782_s14 = sadd.s32 4294967294, %s1112_s12  }
   0xd   : > { %1414 = sst [smem:[#allocation18_spill]] %s1112_s12  ;;  %p75_p0 = scmp.ne.s32.totalorder %s1104_s10, %s1100_s30 }
   0xe   : > { %p76_p1 = scmp.eq.s32.totalorder %s1193_s13, 0  ;;  %p251_p2 = scmp.eq.s32.totalorder %s1193_s13, 1 }
   0xf   : > { %p257_p3 = scmp.eq.s32.totalorder %s782_s14, 1  ;;  %p783_p5 = scmp.ge.s32.totalorder %s1112_s12, 1 }
  0x10   : > { %p1202_p4 = por %p76_p1, %p75_p0  ;;  %p264_p7 = scmp.lt.s32.totalorder %s1112_s12, 3 }
  0x11   : > { %p1207_p6 = por %p257_p3, %p75_p0  ;;  %s1418_s4 = sld [smem:[#allocation22_spill]] }
  0x12   : > { %p1215_p8 = pnand %p783_p5, %p264_p7  ;;  %s1114_s21 = smov [#allocation7]  }
  0x13   : > { %s1416_s16 = scalar_select %p1207_p6, 1, 0 }
  0x14   : > { %p822_p10 = pneg %p1215_p8  ;;  %s281_s22 = sshll.u32 %s1114_s21, 4  ;;  %s282_s22 = int_to_ptr.vmem [resolvable:$true] %s281_s22 }
  0x15   : > { %1417 = sst [smem:[#allocation19_spill]] %s1416_s16  ;;  %s1115_s26 = smov [#allocation8]  }
  0x16   : > { %s1420_s5 = sld [smem:[#allocation23_spill]]  ;;  %p823_p11 = pnand %p822_p10, %p76_p1 }
  0x17   : > { %s279_s19 = sshll.u32 %s1418_s4, 4  ;;  %s293_s27 = sshll.u32 %s1115_s26, 4  ;;  %s280_s19 = int_to_ptr.hbm [resolvable:$true] %s279_s19  ;;  %s294_s27 = int_to_ptr.vmem [resolvable:$true] %s293_s27 }
  0x18   : > { %825 = dma.hbm_to_vmem [thread:$0]  (!%p823_p11), %s280_s19, 64, %s282_s22, [#allocation6]  }
  0x19   : > { %s1228_s28 = sadd.s32 1, %s1112_s12   ;;  %s62_s29 = sadd.s32 1, %s1108_s11 }
  0x1a   : > { %1421 = sst [smem:[#allocation20_spill]] %s1228_s28  ;;  %s59_s14 = ssub.s32 %s1112_s12, %s1228_s28 }
  0x1b   : > { %p69_p12 = scmp.ne.s32.totalorder %s1108_s11, %s1104_s10  ;;  %p60_p13 = scmp.eq.s32.totalorder %s59_s14, 0 }
  0x1c   : > { %s291_s25 = sshll.u32 %s1420_s5, 4  ;;  %p70_p0 = scmp.eq.s32.totalorder %s1112_s12, 0  ;;  %s292_s25 = int_to_ptr.hbm [resolvable:$true] %s291_s25 }
  0x1d   : > { %828 = dma.hbm_to_vmem [thread:$0]  (!%p823_p11), %s292_s25, 128, %s294_s27, [#allocation9]  }
  0x1e   : > { %p1238_p3 = por %p251_p2, %p69_p12  ;;  %p842_p5 = scmp.lt.s32.totalorder %s1112_s12, 2 }
  0x1f   : > { %s1244_s18 = scalar_select %p60_p13, %s1108_s11, %s62_s29  }
  0x20   : > { %p71_p7 = por %p70_p0, %p69_p12  ;;  %s320_s19 = sand.u32 1, %s1108_s11  }
  0x21   : > { %1423 = sst [smem:[#allocation21_spill]] %s1244_s18  ;;  %s1247_s21 = sshll.u32 %s320_s19, 2 }
  0x22   : > { %s788_s22 = sshll.u32 %s1112_s12, 2  ;;  %s324_s26 = scalar_lea.vmem [#allocation2], %s1247_s21 }
  0x23   : > { %s328_s25 = scalar_lea.hbm %s1395_s1, %s788_s22  ;;  %s332_s27 = sshll.u32 %s324_s26, 4  ;;  %s333_s27 = int_to_ptr.vmem [resolvable:$true] %s332_s27 }
  0x24   : > { %s330_s14 = sshll.u32 %s328_s25, 4  ;;  %p1254_p2 = pnand %p842_p5, %p71_p7  ;;  %s331_s14 = int_to_ptr.hbm [resolvable:$true] %s330_s14 }
  0x25   : > { %s347_s18 = scalar_lea.hbm %s1396_s2, %s788_s22  ;;  %s339_s11 = sand.u32 1, %s1112_s12  }
  0x26   : > { %s321_s28 = scalar_lea.sflag [#allocation3], %s320_s19  ;;  %s974_s16 = sshra.s32 %s331_s14, 4  ;;  %s975_s16 = int_to_ptr.hbm [resolvable:$true] %s974_s16 }
  0x27   : > { %s976_s23 = scalar_lea.hbm %s975_s16, 4  ;;  %p978_p11 = pneg %p1254_p2 }
  0x28   : > { %p977_p10 = scmp.ne.s32.totalorder %s975_s16, %s976_s23  ;;  %s981_s26 = scalar_lea.hbm %s1395_s1, 8 }
  0x29   : > { %p982_p0 = scmp.lt.s32.totalorder %s975_s16, %s1395_s1  ;;  %p983_p5 = scmp.lt.s32.totalorder %s981_s26, %s976_s23 }
  0x2a   : > { %p979_p12 = pnand %p978_p11, %p977_p10 }
  0x2b   : > { %p984_p7 = por %p983_p5, %p982_p0 }
  0x2c   : > { %p980_p13 = pneg %p979_p12 }
  0x2e   : > { %p985_p9 = pnand %p984_p7, %p980_p13 }
  0x30   : > { %988 = shalt.err (!%p985_p9)
}
  0x31   : > { %832 = dma.hbm_to_vmem [thread:$0]  (!%p1254_p2), %s331_s14, 64, %s333_s27, %s321_s28  }
  0x32   : > { %s349_s19 = sshll.u32 %s347_s18, 4  ;;  %s343_s22 = scalar_lea.vmem [#allocation5], %s1247_s21  ;;  %s350_s19 = int_to_ptr.hbm [resolvable:$true] %s349_s19 }
  0x33   : > { %s351_s12 = sshll.u32 %s343_s22, 4  ;;  %s340_s24 = scalar_lea.sflag [#allocation6], %s339_s11  ;;  %s352_s12 = int_to_ptr.vmem [resolvable:$true] %s351_s12 }
  0x34   : > { %s1004_s25 = sshra.s32 %s350_s19, 4  ;;  %s1011_s26 = scalar_lea.hbm %s1396_s2, 8  ;;  %s1005_s25 = int_to_ptr.hbm [resolvable:$true] %s1004_s25 }
  0x35   : > { %s1006_s30 = scalar_lea.hbm %s1005_s25, 4  ;;  %p1012_p9 = scmp.lt.s32.totalorder %s1005_s25, %s1396_s2 }
  0x36   : > { %p1007_p10 = scmp.ne.s32.totalorder %s1005_s25, %s1006_s30  ;;  %p1013_p0 = scmp.lt.s32.totalorder %s1011_s26, %s1006_s30 }
  0x38   : > { %p1009_p12 = pnand %p1007_p10, %p978_p11  ;;  %p1014_p5 = por %p1013_p0, %p1012_p9 }
  0x3a   : > { %p1010_p13 = pneg %p1009_p12 }
  0x3c   : > { %p1015_p7 = pnand %p1014_p5, %p1010_p13 }
  0x3e   : > { %1018 = shalt.err (!%p1015_p7)
}
  0x3f   : > { %835 = dma.hbm_to_vmem [thread:$0]  (!%p1254_p2), %s350_s19, 64, %s352_s12, %s340_s24  }
  0x40   : > { %360 = sbr.rel (%p1215_p8) target bundleno = 740 (0x2e4), region = 56  ;;  %s1290_s11 = sand.u32 (!%p1215_p8), 1, %s1104_s10  }
  0x41   : > { %s792_s18 = sshll.u32 (!%p1215_p8), %s1290_s11, 2  ;;  %s363_s21 = scalar_lea.sflag (!%p1215_p8), [#allocation3], %s1290_s11 }
  0x42   : > { %s1294_s27 = scalar_lea.vmem (!%p1215_p8), [#allocation2], %s792_s18 }
  0x45   : > { %1079 = dma.done.wait (%p1202_p4), %s363_s21, 64  }
  0x46   : > { %1081 = vsyncadd (%p1202_p4), %s363_s21, 4294967232  ;;  %s372_s4 = sand.u32 1, %s1193_s13   ;;  %s1301_s12 = scalar_lea.vmem [#allocation5], %s792_s18 }
  0x47   : > { %s373_s30 = scalar_lea.sflag [#allocation6], %s372_s4 }
  0x48   : > { %1083 = dma.done.wait (%p1202_p4), %s373_s30, 64  }
  0x49   : > { %1085 = vsyncadd (%p1202_p4), %s373_s30, 4294967232 }
  0x4a   : > { %1087 = dma.done.wait (%p76_p1), [#allocation6], 64  }
  0x4b   : > { %1089 = vsyncadd (%p76_p1), [#allocation6], 4294967232 }
  0x4c   : > { %1091 = dma.done.wait (%p76_p1), [#allocation9], 128  }
  0x4d   : > { %1093 = vsyncadd (%p76_p1), [#allocation9], 4294967168  ;;  %p431_p8 = scmp.lt.s32.totalorder %s1193_s13, 1  ;;  %s1116_s22 = smov 124   ;;  %v437_v2 = vld [vmem:[%s1400_s6] sm:$0xff]  ;;  %v1120_v3 = vmov 0  }
  0x4e   : > { %s1117_s24 = smov 125   ;;  %s1118_s25 = smov 126   ;;  %886 = vset.pattern.permute.xlu2 %v1120_v3  ;;  %912 = vset.pattern.permute.xlu1 %v1120_v3  ;;  %vm451_vm0 = vcmask 1043456   ;;  %v436_v9 = vld [vmem:[#allocation8] sm:$0xff]  ;;  %vm459_vm1 = vcmask 162816   ;;  %vm498_vm3 = vcmask 7168  }
  0x4f   : > { %s432_s20 = scalar_select %p431_p8, %s1193_s13, 1  ;;  %456 = vperm.xlu2 %886, %v437_v2   ;;  %913 = vset.pattern.permute.xlu0 %v1120_v3  ;;  %v490_v17 = vld [vmem:[%s1397_s3] sm:$0x7]  ;;  %v491_v18 = vld [vmem:[#allocation7] sm:$0x7]  ;;  %vm503_vm4 = vcmask 220160  }
  0x50   : > { %s1119_s16 = smov 127   ;;  %s1121_s5 = smov 1   ;;  %v505_v19 = vperm.slane %v490_v17, 0  ;;  %v513_v20 = vperm.slane %v491_v18, 0  ;;  %v507_v22 = vperm.slane %v490_v17, 1  ;;  %v515_v23 = vperm.slane %v491_v18, 1 }
  0x51   : > { %s797_s14 = sshll.u32 %s432_s20, 2  ;;  %v510_v26 = vperm.slane %v490_v17, 2  ;;  %v518_v27 = vperm.slane %v491_v18, 2  ;;  %v489_v38 = vld [vmem:[%s1301_s12] sm:$0xf]  ;;  %vm560_vm5 = vcmask 490496  }
  0x52   : > { %s434_s19 = scalar_lea.vmem %s1394_s0, %s797_s14  ;;  %v488_v39 = vld [vmem:[%s1294_s27] sm:$0xf]  ;;  %s796_s12 = sshll.u32 %s1290_s11, 3  ;;  %vm640_vm6 = vcmask 211968  }
  0x53   : > { %v435_v0 = vld [vmem:[%s434_s19] sm:$0xf]  ;;  %s805_s20 = sshll.u32 %s1193_s13, 3  ;;  %s430_s19 = scalar_lea.vmem [#allocation10], %s796_s12 }
  0x54   : > { %449 = vrot.lane.b32.xlu0 %v435_v0, %s1116_s22  ;;  %v439_v1 = vrot.slane %v435_v0, 4  ;;  %v493_v58 = vld [vmem:[%s1402_s8] sm:$0xf]  ;;  %s653_s15 = scalar_lea.hbm %s1403_s9, %s805_s20  ;;  %s655_s22 = sshll.u32 %s430_s19, 4  ;;  %s656_s22 = int_to_ptr.vmem [resolvable:$true] %s655_s22 }
  0x55   : > { %s643_s13 = scalar_lea.sflag [#allocation4], %s1290_s11 }
  0x56   : > { %446 = vrot.lane.b32.xlu1 %v439_v1, %s1117_s24  ;;  %s657_s24 = sshll.u32 %s653_s15, 4  ;;  %s658_s24 = int_to_ptr.hbm [resolvable:$true] %s657_s24 }
  0x5c   : > { %443 = vrot.lane.b32.xlu0 %v435_v0, %s1118_s25 }
  0x5e   : > { %440 = vrot.lane.b32.xlu1 %v439_v1, %s1119_s16 }
  0xa9   : > { %v457_v11 = vpop.permute.xlu2 %456 }
  0xc6   : > { %v450_v4 = vpop.permute.xlu0 %449 }
  0xc7   : > { %798 = vmatpush.msk.msra.mxu0 %vm451_vm0, %v450_v4 }
  0xc8   : > { %v447_v5 = vpop.permute.xlu1 %446 }
  0xce   : > { %v444_v6 = vpop.permute.xlu0 %443 }
  0xcf   : > { %v453_v7 = vsel %vm451_vm0, %v444_v6, %v447_v5 }
  0xd0   : > { %479 = vmatpush.msra.mxu0 %v453_v7  ;;  %v441_v8 = vpop.permute.xlu1 %440 }
  0xd1   : > { %v452_v10 = vsel %vm451_vm0, %v435_v0, %v441_v8 }
  0xd2   : > { %480 = vmatpush.msra.mxu0 %v452_v10 }
  0xd3   : > { %799 = vmatmul.msk.f32.vlgmr.msra.gmra.mxu0 %vm459_vm1, %v436_v9 }
 0x150   : > { %v482_v12 = vpop.f32.mrf.mxu0 }
 0x151   : > { %v483_v13 = vadd.f32 %v482_v12, %v457_v11 }
 0x153   : > { %vm485_vm2 = vcmp.gt.f32.partialorder %v483_v13, 0.0  ;;  %v486_v14 = vmul.f32 0.3, %v483_v13 }
 0x155   : > { %v487_v15 = vsel %vm485_vm2, %v483_v13, %v486_v14  ;;  %v492_v13 = vld [vmem:[%s1401_s7] sm:$0xf] }
 0x156   : > { %500 = vrot.lane.b32.xlu0 %v487_v15, %s1119_s16  ;;  %495 = vrot.lane.b32.xlu2 %v487_v15, %s1121_s5  ;;  %v508_v28 = vmul.f32 %v507_v22, %v487_v15  ;;  %v516_v29 = vmul.f32 %v515_v23, %v487_v15  ;;  %s1054_s5 = scalar_lea.hbm %s1403_s9, 16 }
 0x1b0   : > { %v496_v16 = vpop.permute.xlu2 %495 }
 0x1b1   : > { %v499_v21 = vsel %vm498_vm3, 0.0, %v496_v16 }
 0x1b2   : > { %v506_v24 = vmul.f32 %v505_v19, %v499_v21  ;;  %v514_v25 = vmul.f32 %v513_v20, %v499_v21 }
 0x1b4   : > { %v509_v32 = vadd.f32 %v508_v28, %v506_v24  ;;  %v517_v33 = vadd.f32 %v516_v29, %v514_v25 }
 0x1c8   : > { %v501_v30 = vpop.permute.xlu0 %500 }
 0x1c9   : > { %v504_v31 = vsel %vm503_vm4, %v501_v30, 0.0 }
 0x1ca   : > { %v511_v34 = vmul.f32 %v510_v26, %v504_v31  ;;  %v519_v35 = vmul.f32 %v518_v27, %v504_v31 }
 0x1cc   : > { %v512_v36 = vadd.f32 %v511_v34, %v509_v32  ;;  %v520_v37 = vadd.f32 %v519_v35, %v517_v33 }
 0x1ce   : > { %v522_v40 = vrot.slane %v512_v36, 4  ;;  %v526_v41 = vrot.slane %v520_v37, 4 }
 0x1d0   : > { %609 = vrot.lane.b32.xlu1 %v526_v41, %s1118_s25  ;;  %v528_v42 = vsel %vm451_vm0, %v489_v38, %v526_v41  ;;  %v524_v43 = vsel %vm451_vm0, %v488_v39, %v522_v40  ;;  %v587_v44 = vrot.slane %v522_v40, 4  ;;  %v531_v52 = vrot.slane %v526_v41, 4 }
 0x1d1   : > { %v887_v45 = vpack.i.bf16 %v528_v42, %v526_v41  ;;  %v586_v46 = vrot.slane %v524_v43, 4  ;;  %v530_v47 = vrot.slane %v528_v42, 4 }
 0x1d3   : > { %888 = vrot.lane.b32.xlu0 %v887_v45, %s1119_s16  ;;  %v588_v48 = vsel %vm451_vm0, %v586_v46, %v587_v44  ;;  %v553_v49 = vsel %vm451_vm0, %v522_v40, %v530_v47  ;;  %v892_v51 = vpack.i.bf16 %v524_v43, %v586_v46  ;;  %v532_v54 = vsel %vm451_vm0, %v530_v47, %v531_v52 }
 0x1d4   : > { %v897_v50 = vpack.i.bf16 %v588_v48, %v528_v42  ;;  %v902_v53 = vpack.i.bf16 %v586_v46, %v588_v48  ;;  %v907_v55 = vpack.i.bf16 %v522_v40, %v532_v54 }
 0x1d6   : > { %898 = vrot.lane.b32.xlu2 %v897_v50, %s1118_s25 }
 0x1d8   : > { %893 = vrot.lane.b32.xlu1 %v892_v51, %s1118_s25 }
 0x1db   : > { %903 = vrot.lane.b32.xlu0 %v902_v53, %s1119_s16 }
 0x1de   : > { %550 = vrot.lane.b32.xlu2 %v522_v40, %s1118_s25  ;;  %s1048_s25 = sshra.s32 %s658_s24, 4  ;;  %s1049_s25 = int_to_ptr.hbm [resolvable:$true] %s1048_s25 }
 0x1df   : > { %p1055_p11 = scmp.lt.s32.totalorder %s1049_s25, %s1403_s9 }
 0x1e0   : > { %908 = vrot.lane.b32.xlu1 %v907_v55, %s1119_s16 }
 0x1e3   : > { %536 = vrot.lane.b32.xlu0 %v524_v43, %s1119_s16 }
 0x1e6   : > { %542 = vrot.lane.b32.xlu2 %v530_v47, %s1119_s16  ;;  %s1050_s16 = scalar_lea.hbm %s1049_s25, 8 }
 0x1e7   : > { %p1051_p1 = scmp.ne.s32.totalorder %s1049_s25, %s1050_s16  ;;  %p1056_p10 = scmp.lt.s32.totalorder %s1054_s5, %s1050_s16 }
 0x1e8   : > { %557 = vperm.xlu1 %912, %v493_v58  }
 0x1e9   : > { %p1052_p4 = pnand %p1051_p1, %p1238_p3  ;;  %p1057_p12 = por %p1056_p10, %p1055_p11 }
 0x1eb   : > { %p1053_p2 = pneg %p1052_p4 }
 0x1ed   : > { %p1058_p13 = pnand %p1057_p12, %p1053_p2 }
 0x230   : > { %v899_v56 = vpop.permute.xlu2 %898 }
 0x231   : > { %v900_v60 = vunpack.i.l.bf16 %v899_v56  ;;  %v901_v62 = vunpack.i.h.bf16 %v899_v56 }
 0x238   : > { %v551_v57 = vpop.permute.xlu2 %550 }
 0x239   : > { %800 = vmatpush.msk.msra.mxu1 %vm451_vm0, %v551_v57 }
 0x240   : > { %v543_v12 = vpop.permute.xlu2 %542 }
 0x242   : > { %v610_v59 = vpop.permute.xlu1 %609 }
 0x243   : > { %802 = vmatpush.msk.msra.mxu2 %vm451_vm0, %v610_v59 }
 0x245   : > { %v889_v61 = vpop.permute.xlu0 %888  ;;  %625 = vmatpush.msra.mxu2 %v900_v60 }
 0x246   : > { %v890_v0 = vunpack.i.l.bf16 %v889_v61  ;;  %v891_v5 = vunpack.i.h.bf16 %v889_v61 }
 0x247   : > { %626 = vmatpush.msra.mxu2 %v901_v62 }
 0x24a   : > { %v894_v63 = vpop.permute.xlu1 %893 }
 0x24b   : > { %v895_v1 = vunpack.i.l.bf16 %v894_v63  ;;  %v896_v2 = vunpack.i.h.bf16 %v894_v63 }
 0x24d   : > { %v904_v3 = vpop.permute.xlu0 %903  ;;  %575 = vmatpush.msra.mxu1 %v896_v2  ;;  %v613_v4 = vsel %vm451_vm0, %v890_v0, %v895_v1 }
 0x24e   : > { %627 = vmatpush.msra.mxu2 %v613_v4  ;;  %v906_v6 = vunpack.i.h.bf16 %v904_v3  ;;  %v905_v7 = vunpack.i.l.bf16 %v904_v3 }
 0x250   : > { %628 = vmatpush.msra.mxu2 %v891_v5  ;;  %v612_v10 = vsel %vm451_vm0, %v526_v41, %v906_v6 }
 0x252   : > { %v909_v8 = vpop.permute.xlu1 %908  ;;  %629 = vmatpush.msra.mxu2 %v905_v7 }
 0x253   : > { %v911_v9 = vunpack.i.h.bf16 %v909_v8  ;;  %v910_v11 = vunpack.i.l.bf16 %v909_v8 }
 0x254   : > { %630 = vmatpush.msra.mxu2 %v612_v10 }
 0x255   : > { %576 = vmatpush.msra.mxu1 %v910_v11  ;;  %v554_v14 = vsel %vm451_vm0, %v911_v9, %v543_v12  ;;  %v537_v15 = vpop.permute.xlu0 %536 }
 0x256   : > { %631 = vmatpush.msra.mxu2 %v528_v42 }
 0x257   : > { %577 = vmatpush.msra.mxu1 %v554_v14  ;;  %803 = vmatmul.msk.f32.vlgmr.msra.gmra.mxu2 %vm560_vm5, %v492_v13 }
 0x259   : > { %578 = vmatpush.msra.mxu1 %v537_v15 }
 0x25a   : > { %v558_v16 = vpop.permute.xlu1 %557 }
 0x25b   : > { %579 = vmatpush.msra.mxu1 %v532_v54 }
 0x25d   : > { %580 = vmatpush.msra.mxu1 %v553_v49 }
 0x25f   : > { %581 = vmatpush.msra.mxu1 %v524_v43 }
 0x260   : > { %801 = vmatmul.msk.f32.vlgmr.msra.gmra.mxu1 %vm560_vm5, %v492_v13 }
 0x2da   : > { %v633_v17 = vpop.f32.mrf.mxu2 }
 0x2db   : > { %v634_v18 = vadd.f32 %v633_v17, %v558_v16 }
 0x2dd   : > { %v637_v19 = vrot.slane %v634_v18, 4  ;;  %v583_v20 = vpop.f32.mrf.mxu1 }
 0x2de   : > { %v584_v21 = vadd.f32 %v583_v20, %v558_v16 }
 0x2e0   : > { %v639_v22 = vsel %vm451_vm0, %v584_v21, %v637_v19 }
 0x2e1   : > { %641 = vst.msk [vmem:[%s430_s19] sm:$0xff] %vm640_vm6, %v639_v22 }
 0x2e2   : > { %1061 = shalt.err (!%p1058_p13)
}
 0x2e3   : > { %820 = dma.vmem_to_hbm [thread:$0]  (%p1238_p3), %s656_s22, 128, %s658_s24, %s643_s13  }
 0x2e4 PF: > { %s1425_s11 = sld [smem:[#allocation16_spill]] }
 0x2e5   : > { %s1427_s27 = sld [smem:[#allocation18_spill]] }
 0x2ea   : > { %s669_s4 = sand.u32 1, %s1425_s11  }
 0x2eb   : > { %p1428_p9 = scmp.ge.s32.totalorder %s1427_s27, 2  ;;  %s670_s30 = scalar_lea.sflag [#allocation4], %s669_s4 }
 0x2ed   : > { %p837_p0 = pnand %p1428_p9, %p1207_p6 }
 0x2ef   : > { %p838_p5 = pneg %p837_p0 }
 0x2f1   : > { %1095 = dma.done.wait (%p838_p5), %s670_s30, 128  }
 0x2f2   : > { %1097 = vsyncadd (%p838_p5), %s670_s30, 4294967168  ;;  %s1429_s12 = sld [smem:[#allocation20_spill]]  ;;  %s1432_s30 = smov %s1104_s10 }
 0x2f3   : > { %s1430_s20 = sld [smem:[#allocation17_spill]] }
 0x2f4   : > { %s1431_s11 = sld [smem:[#allocation21_spill]] }
 0x2f8   : > { %p26_p7 = scmp.ge.s32.totalorder %s1429_s12, 4  }
 0x2f9   : > { %s1433_s10 = smov %s1430_s20 }
 0x2fa   :  { %28 = sbr.rel (!%p26_p7) target bundleno = 11 (0xb), region = 125 }
 0x2ff   :  { %676 = vsyncpa [#allocation3], 1 }
 0x300   :  { %678 = vsyncpa [#allocation3 + $0x1], 1 }
 0x301   :  { %679 = vsyncpa [#allocation6], 1 }
 0x302   :  { %681 = vsyncpa [#allocation6 + $0x1], 1 }
 0x303   :  { %682 = vsyncpa [#allocation9], 1 }
 0x304   :  { %683 = vsyncpa [#allocation4], 1 }
 0x305   :  { %685 = vsyncpa [#allocation4 + $0x1], 1 }

</bundles_post_ra>
